<compile_context>
chip_gen: v6e
topology: v6e:2x2x1
jax: 0.10.0
libtpu: 0.0.40
codegen_flags: <defaults>
</compile_context>

<pallas_src>
import jax
import jax.numpy as jnp
from jax.experimental import pallas as pl
from jax.experimental.pallas import tpu as pltpu


def enn_kernel(x_ref, w_ref, b_ref, o_ref, acc_ref):
    # x_ref: (tb, tk)   w_ref: (tk, tc)   b_ref: (1, tc)
    # o_ref: (tb, tc)   acc_ref: (tb, tc) f32 scratch (resident across k)
    k = pl.program_id(2)

    @pl.when(k == 0)
    def _():
        acc_ref[...] = jnp.zeros_like(acc_ref)

    acc_ref[...] += jnp.dot(x_ref[...], w_ref[...],
                            preferred_element_type=jnp.float32)

    @pl.when(k == pl.num_programs(2) - 1)
    def _():
        y = acc_ref[...] + b_ref[...]            # bias broadcast over rows
        # ELU (alpha=1): y if y > 0 else exp(y) - 1  (clamp exp arg for safety)
        neg = jnp.exp(jnp.minimum(y, 0.0)) - 1.0
        o_ref[...] = (jnp.where(y > 0.0, y, neg) + 2.0).astype(o_ref.dtype)


def _round_up(x, m):
    return ((x + m - 1) // m) * m


def _pick_tile(dim_padded, candidates):
    for c in candidates:
        if dim_padded % c == 0:
            return c
    return dim_padded


def enn_forward(x, w, b, *, tb=None, tc=None, tk=None):
    B, D = x.shape
    Dw, C = w.shape
    assert D == Dw and b.shape == (1, C)

    # Pad to hardware-friendly shapes.  Zero padding is exact for the matmul;
    # padded rows/columns are sliced off before returning.
    B_pad = _round_up(B, 8)
    D_pad = _round_up(D, 128)
    C_pad = _round_up(C, 128)

    # Big tiles amortize the ~0.35 us/step grid overhead; lane dim >= 128
    # keeps stores unmasked (lane-dense).
    if tb is None:
        tb = _pick_tile(B_pad, (512, 256, 128, 64, 32, 16, 8))
    if tk is None:
        tk = _pick_tile(D_pad, (512, 256, 128))
    if tc is None:
        tc = _pick_tile(C_pad, (512, 256, 128))

    xp = x if (B_pad == B and D_pad == D) else jnp.pad(
        x, ((0, B_pad - B), (0, D_pad - D)))
    wp = w if (D_pad == D and C_pad == C) else jnp.pad(
        w, ((0, D_pad - D), (0, C_pad - C)))
    bp = b if C_pad == C else jnp.pad(b, ((0, 0), (0, C_pad - C)))

    grid = (B_pad // tb, C_pad // tc, D_pad // tk)

    out = pl.pallas_call(
        enn_kernel,
        out_shape=jax.ShapeDtypeStruct((B_pad, C_pad), jnp.float32),
        grid_spec=pltpu.PrefetchScalarGridSpec(
            num_scalar_prefetch=0,
            grid=grid,
            in_specs=[
                pl.BlockSpec((tb, tk), lambda i, j, k: (i, k)),   # activations
                pl.BlockSpec((tk, tc), lambda i, j, k: (k, j)),   # weight tile
                pl.BlockSpec((1, tc), lambda i, j, k: (0, j)),    # bias tile
            ],
            out_specs=pl.BlockSpec((tb, tc), lambda i, j, k: (i, j)),
            scratch_shapes=[pltpu.VMEM((tb, tc), jnp.float32)],
        ),
        compiler_params=pltpu.CompilerParams(
            dimension_semantics=("parallel", "parallel", "arbitrary"),
            vmem_limit_bytes=48 * 1024 * 1024,   # headroom vs v7x 64 MiB VMEM
        ),
    )(xp, wp, bp)

    return out[:B, :C]


def enn_reference(x, w, b):
    y = x @ w + b
    return jnp.where(y > 0.0, y, jnp.exp(jnp.minimum(y, 0.0)) - 1.0) + 2.0


if __name__ == "__main__":
    key = jax.random.PRNGKey(0)

    # Case 1: original toy shape (batch=16, hidden=32, classes=8).
    kx, kw, kb = jax.random.split(key, 3)
    B, D, C = 16, 32, 8
    x = jax.random.normal(kx, (B, D), dtype=jnp.float32)
    w = jax.random.normal(kw, (D, C), dtype=jnp.float32) * 0.1
    b = jax.random.normal(kb, (1, C), dtype=jnp.float32) * 0.1

    out = enn_forward(x, w, b)
    jax.block_until_ready(out)
    ref = enn_reference(x, w, b)
    assert out.shape == (B, C)
    assert jnp.allclose(out, ref, atol=1e-5, rtol=1e-5)

    # Case 2: ragged shapes (exercise the pad-to-(8,128) path; B not a
    # multiple of the tile, D/C not multiples of 128).
    kx2, kw2, kb2 = jax.random.split(jax.random.PRNGKey(0), 3)
    B2, D2, C2 = 12, 200, 10
    x2 = jax.random.normal(kx2, (B2, D2), dtype=jnp.float32)
    w2 = jax.random.normal(kw2, (D2, C2), dtype=jnp.float32) * 0.1
    b2 = jax.random.normal(kb2, (1, C2), dtype=jnp.float32) * 0.1

    out2 = enn_forward(x2, w2, b2)
    jax.block_until_ready(out2)
    ref2 = enn_reference(x2, w2, b2)
    assert out2.shape == (B2, C2)
    assert jnp.allclose(out2, ref2, atol=1e-5, rtol=1e-5)

    print("KERNEL_OK")
</pallas_src>

<mosaic_0001>
module attributes {stable_mosaic.version = 11 : i64} {
  func.func @enn_kernel(%arg0: i32, %arg1: i32, %arg2: i32, %arg3: memref<16x128xf32, #tpu.memory_space<vmem>>, %arg4: memref<128x128xf32, #tpu.memory_space<vmem>>, %arg5: memref<1x128xf32, #tpu.memory_space<vmem>>, %arg6: memref<16x128xf32, #tpu.memory_space<vmem>>, %arg7: memref<16x128xf32, #tpu.memory_space<vmem>>) attributes {dimension_semantics = [#tpu.dimension_semantics<parallel>, #tpu.dimension_semantics<parallel>, #tpu.dimension_semantics<arbitrary>], iteration_bounds = array<i64: 1, 1, 1>, scalar_prefetch = 0 : i64, scratch_operands = 1 : i64, tpu.core_type = #tpu.core_type<tc>, window_params = [{transform_indices = @transform_0, window_bounds = array<i64: 16, 128>}, {transform_indices = @transform_1, window_bounds = array<i64: 128, 128>}, {transform_indices = @transform_2, window_bounds = array<i64: 1, 128>}, {transform_indices = @transform_3, window_bounds = array<i64: 16, 128>}]} {
    %c0_i32 = arith.constant 0 : i32
    %0 = arith.cmpi eq, %arg2, %c0_i32 : i32
    %1 = arith.extui %0 : i1 to i32
    %c0_i32_0 = arith.constant 0 : i32
    %2 = arith.cmpi ne, %1, %c0_i32_0 : i32
    scf.if %2 {
      %cst_10 = arith.constant 0.000000e+00 : f32
      %12 = vector.broadcast %cst_10 : f32 to vector<16x128xf32>
      %c0_11 = arith.constant 0 : index
      %c0_12 = arith.constant 0 : index
      %13 = vector.load %arg7[%c0_11, %c0_12] : memref<16x128xf32, #tpu.memory_space<vmem>>, vector<16x128xf32>
      tpu.vector_store %arg7[%c0_11, %c0_12], %12 {strides = array<i32>} : memref<16x128xf32, #tpu.memory_space<vmem>>, vector<16x128xf32>,
    } else {
    }
    %c0 = arith.constant 0 : index
    %c0_1 = arith.constant 0 : index
    %3 = vector.load %arg7[%c0, %c0_1] : memref<16x128xf32, #tpu.memory_space<vmem>>, vector<16x128xf32>
    %c0_2 = arith.constant 0 : index
    %c0_3 = arith.constant 0 : index
    %4 = vector.load %arg3[%c0_2, %c0_3] : memref<16x128xf32, #tpu.memory_space<vmem>>, vector<16x128xf32>
    %c0_4 = arith.constant 0 : index
    %c0_5 = arith.constant 0 : index
    %5 = vector.load %arg4[%c0_4, %c0_5] : memref<128x128xf32, #tpu.memory_space<vmem>>, vector<128x128xf32>
    %cst = arith.constant dense<0.000000e+00> : vector<16x128xf32>
    %6 = tpu.matmul %4, %5, %cst {dimension_numbers = #tpu.dot_dimension_numbers<[1], [0], [0], [1], [0, 0, 1, 1], [], []>} : vector<16x128xf32>, vector<128x128xf32>, vector<16x128xf32> -> vector<16x128xf32>
    %7 = arith.addf %3, %6 : vector<16x128xf32>
    %c0_6 = arith.constant 0 : index
    %c0_7 = arith.constant 0 : index
    %8 = vector.load %arg7[%c0_6, %c0_7] : memref<16x128xf32, #tpu.memory_space<vmem>>, vector<16x128xf32>
    tpu.vector_store %arg7[%c0_6, %c0_7], %7 {strides = array<i32>} : memref<16x128xf32, #tpu.memory_space<vmem>>, vector<16x128xf32>,
    %c0_i32_8 = arith.constant 0 : i32
    %9 = arith.cmpi eq, %arg2, %c0_i32_8 : i32
    %10 = arith.extui %9 : i1 to i32
    %c0_i32_9 = arith.constant 0 : i32
    %11 = arith.cmpi ne, %10, %c0_i32_9 : i32
    scf.if %11 {
      %c0_10 = arith.constant 0 : index
      %c0_11 = arith.constant 0 : index
      %12 = vector.load %arg7[%c0_10, %c0_11] : memref<16x128xf32, #tpu.memory_space<vmem>>, vector<16x128xf32>
      %c0_12 = arith.constant 0 : index
      %c0_13 = arith.constant 0 : index
      %13 = vector.load %arg5[%c0_12, %c0_13] : memref<1x128xf32, #tpu.memory_space<vmem>>, vector<1x128xf32>
      %14 = vector.broadcast %13 : vector<1x128xf32> to vector<16x128xf32>
      %15 = arith.addf %12, %14 : vector<16x128xf32>
      %cst_14 = arith.constant 0.000000e+00 : f32
      %16 = vector.broadcast %cst_14 : f32 to vector<16x128xf32>
      %17 = arith.minimumf %15, %16 : vector<16x128xf32>
      %18 = math.exp %17 : vector<16x128xf32>
      %cst_15 = arith.constant 1.000000e+00 : f32
      %19 = vector.broadcast %cst_15 : f32 to vector<16x128xf32>
      %20 = arith.subf %18, %19 : vector<16x128xf32>
      %cst_16 = arith.constant 0.000000e+00 : f32
      %21 = vector.broadcast %cst_16 : f32 to vector<16x128xf32>
      %22 = arith.cmpf ogt, %15, %21 : vector<16x128xf32>
      %23 = arith.select %22, %15, %20 : vector<16x128xi1>, vector<16x128xf32>
      %cst_17 = arith.constant 2.000000e+00 : f32
      %24 = vector.broadcast %cst_17 : f32 to vector<16x128xf32>
      %25 = arith.addf %23, %24 : vector<16x128xf32>
      %c0_18 = arith.constant 0 : index
      %c0_19 = arith.constant 0 : index
      %26 = vector.load %arg6[%c0_18, %c0_19] : memref<16x128xf32, #tpu.memory_space<vmem>>, vector<16x128xf32>
      tpu.vector_store %arg6[%c0_18, %c0_19], %25 {strides = array<i32>} : memref<16x128xf32, #tpu.memory_space<vmem>>, vector<16x128xf32>,
    } else {
    }
    return
  }
  func.func @transform_0(%arg0: i32, %arg1: i32, %arg2: i32) -> (i32, i32) {
    %c0_i32 = arith.constant 0 : i32
    return %arg0, %arg2 : i32, i32
  }
  func.func @transform_1(%arg0: i32, %arg1: i32, %arg2: i32) -> (i32, i32) {
    %c0_i32 = arith.constant 0 : i32
    return %arg2, %arg1 : i32, i32
  }
  func.func @transform_2(%arg0: i32, %arg1: i32, %arg2: i32) -> (i32, i32) {
    %c0_i32 = arith.constant 0 : i32
    %c0_i32_0 = arith.constant 0 : i32
    return %c0_i32, %arg1 : i32, i32
  }
  func.func @transform_3(%arg0: i32, %arg1: i32, %arg2: i32) -> (i32, i32) {
    %c0_i32 = arith.constant 0 : i32
    return %arg0, %arg1 : i32, i32
  }
}

</mosaic_0001>

<bundles_post_ra>
// kernel: tpu_custom_call.1
= control target key start
LH: loop header
LB: loop body
LE: loop exit
PB: predicated region body
PF: predicated region fallthrough
CT: control target
= control target key end

     0   :  { %8 = vsyncpa [#allocation4], 0  ;;  %s373_s0 = inlined_call_operand.hbm [shape: f32[16,128], index: 0, kind: input, shape index: {}]   ;;  %s374_s1 = inlined_call_operand.hbm [shape: f32[128,128], index: 1, kind: input, shape index: {}]   ;;  %s375_s2 = inlined_call_operand.vmem [shape: f32[1,128], index: 2, kind: input, shape index: {}]   ;;  %s376_s3 = inlined_call_operand.hbm [shape: f32[16,128], index: 3, kind: output, shape index: {}]  }
   0x1   :  { %9 = vsyncpa [#allocation7], 0 }
   0x2   :  { %10 = vsyncpa [#allocation5], 0  ;;  %s327_s12 = smov [#allocation3]  }
   0x3   :  { %s16_s13 = sshll.u32 %s327_s12, 4  ;;  %s17_s13 = int_to_ptr.vmem [resolvable:$true] %s16_s13 }
   0x4   :  { %s269_s14 = scalar_lea.vmem %s17_s13, 256  ;;  %p274_p1 = scmp.lt.s32.totalorder %s17_s13, %s17_s13 }
   0x5   :  { %p270_p0 = scmp.ne.s32.totalorder %s17_s13, %s269_s14  ;;  %p275_p2 = scmp.lt.s32.totalorder %s269_s14, %s269_s14 }
   0x7   :  { %p276_p3 = por %p275_p2, %p274_p1 }
   0x9   :  { %p277_p4 = pnand %p276_p3, %p270_p0 }
   0xb   :  { %280 = shalt.err (!%p277_p4)
}
   0xc   :  { %s328_s15 = smov 128   ;;  %s329_s16 = smov 8  }
   0xd   :  { %22 = dma.hbm_to_vmem [thread:$0]  %s373_s0, 256, %s17_s13, [#allocation4], %s328_s15, %s328_s15, %s329_s16  }
   0xe   :  { %s330_s19 = smov [#allocation6]  }
   0xf   :  { %s28_s20 = sshll.u32 %s330_s19, 4  ;;  %s29_s20 = int_to_ptr.vmem [resolvable:$true] %s28_s20 }
  0x10   :  { %s289_s21 = scalar_lea.vmem %s29_s20, 2048  ;;  %p294_p6 = scmp.lt.s32.totalorder %s29_s20, %s29_s20 }
  0x11   :  { %p290_p5 = scmp.ne.s32.totalorder %s29_s20, %s289_s21  ;;  %p295_p7 = scmp.lt.s32.totalorder %s289_s21, %s289_s21 }
  0x13   :  { %p296_p8 = por %p295_p7, %p294_p6 }
  0x15   :  { %p297_p9 = pnand %p296_p8, %p290_p5 }
  0x17   :  { %300 = shalt.err (!%p297_p9)
}
  0x18   :  { %34 = dma.hbm_to_vmem [thread:$0]  %s374_s1, 2048, %s29_s20, [#allocation7], %s328_s15, %s328_s15, %s329_s16  }
  0x19   :  { %321 = dma.done.wait [#allocation4], 256  }
  0x1a   :  { %322 = vsyncadd [#allocation4], 4294967040 }
  0x1b   :  { %323 = dma.done.wait [#allocation7], 2048  }
  0x1c   :  { %324 = vsyncadd [#allocation7], 4294965248  ;;  %v68_v0 = vld [vmem:[#allocation6 + $0x78] sm:$0xff]  ;;  %v67_v1 = vld [vmem:[#allocation6 + $0x70] sm:$0xff]  ;;  %s331_s24 = smov [#allocation8]  }
  0x1d   :  { %217 = vmatprep.subr.mxu0 %v68_v0  ;;  %v66_v2 = vld [vmem:[#allocation6 + $0x68] sm:$0xff]  ;;  %v65_v3 = vld [vmem:[#allocation6 + $0x60] sm:$0xff]  ;;  %v51_v4 = vld [vmem:[#allocation3] sm:$0xff]  ;;  %s183_s25 = sshll.u32 %s331_s24, 4  ;;  %s184_s25 = int_to_ptr.vmem [resolvable:$true] %s183_s25 }
  0x1e   :  { %218 = vmatpush3.msra.mxu0 %v68_v0  ;;  %v64_v5 = vld [vmem:[#allocation6 + $0x58] sm:$0xff]  ;;  %249 = vmatprep.mubr.f32.mxu0 %v51_v4  ;;  %v63_v6 = vld [vmem:[#allocation6 + $0x50] sm:$0xff]  ;;  %v62_v7 = vld [vmem:[#allocation6 + $0x48] sm:$0xff]  ;;  %p306_p11 = scmp.lt.s32.totalorder %s184_s25, %s184_s25 }
  0x1f   :  { %219 = vmatprep.subr.mxu0 %v67_v1  ;;  %v61_v8 = vld [vmem:[#allocation6 + $0x40] sm:$0xff]  ;;  %v60_v9 = vld [vmem:[#allocation6 + $0x38] sm:$0xff]  ;;  %v59_v10 = vld [vmem:[#allocation6 + $0x30] sm:$0xff] }
  0x20   :  { %220 = vmatpush3.msra.mxu0 %v67_v1  ;;  %v58_v11 = vld [vmem:[#allocation6 + $0x28] sm:$0xff]  ;;  %v57_v12 = vld [vmem:[#allocation6 + $0x20] sm:$0xff]  ;;  %v56_v13 = vld [vmem:[#allocation6 + $0x18] sm:$0xff] }
  0x21   :  { %221 = vmatprep.subr.mxu0 %v66_v2  ;;  %v55_v14 = vld [vmem:[#allocation6 + $0x10] sm:$0xff]  ;;  %v54_v15 = vld [vmem:[#allocation6 + $0x8] sm:$0xff]  ;;  %v53_v16 = vld [vmem:[#allocation6] sm:$0xff] }
  0x22   :  { %222 = vmatpush3.msra.mxu0 %v66_v2  ;;  %v52_v17 = vld [vmem:[#allocation3 + $0x8] sm:$0xff]  ;;  %v196_v18 = vld [vmem:[%s375_s2] ss:$0 sm:$0xff]  ;;  %s301_s2 = scalar_lea.vmem %s184_s25, 256 }
  0x23   :  { %223 = vmatprep.subr.mxu0 %v65_v3  ;;  %p302_p10 = scmp.ne.s32.totalorder %s184_s25, %s301_s2  ;;  %p307_p12 = scmp.lt.s32.totalorder %s301_s2, %s301_s2 }
  0x24   :  { %224 = vmatpush3.msra.mxu0 %v65_v3 }
  0x25   :  { %225 = vmatprep.subr.mxu0 %v64_v5  ;;  %p308_p13 = por %p307_p12, %p306_p11 }
  0x26   :  { %226 = vmatpush3.msra.mxu0 %v64_v5 }
  0x27   :  { %227 = vmatprep.subr.mxu0 %v63_v6  ;;  %p309_p0 = pnand %p308_p13, %p302_p10 }
  0x28   :  { %228 = vmatpush3.msra.mxu0 %v63_v6 }
  0x29   :  { %229 = vmatprep.subr.mxu0 %v62_v7 }
  0x2a   :  { %230 = vmatpush3.msra.mxu0 %v62_v7 }
  0x2b   :  { %231 = vmatprep.subr.mxu0 %v61_v8 }
  0x2c   :  { %232 = vmatpush3.msra.mxu0 %v61_v8 }
  0x2d   :  { %233 = vmatprep.subr.mxu0 %v60_v9 }
  0x2e   :  { %234 = vmatpush3.msra.mxu0 %v60_v9 }
  0x2f   :  { %235 = vmatprep.subr.mxu0 %v59_v10 }
  0x30   :  { %236 = vmatpush3.msra.mxu0 %v59_v10 }
  0x31   :  { %237 = vmatprep.subr.mxu0 %v58_v11 }
  0x32   :  { %238 = vmatpush3.msra.mxu0 %v58_v11 }
  0x33   :  { %239 = vmatprep.subr.mxu0 %v57_v12 }
  0x34   :  { %240 = vmatpush3.msra.mxu0 %v57_v12 }
  0x35   :  { %241 = vmatprep.subr.mxu0 %v56_v13 }
  0x36   :  { %242 = vmatpush3.msra.mxu0 %v56_v13 }
  0x37   :  { %243 = vmatprep.subr.mxu0 %v55_v14 }
  0x38   :  { %244 = vmatpush3.msra.mxu0 %v55_v14 }
  0x39   :  { %245 = vmatprep.subr.mxu0 %v54_v15 }
  0x3a   :  { %246 = vmatpush3.msra.mxu0 %v54_v15 }
  0x3b   :  { %247 = vmatprep.subr.mxu0 %v53_v16 }
  0x3c   :  { %248 = vmatpush3.msra.mxu0 %v53_v16 }
  0x3d   :  { %250 = vmatmul.mubr.f32.vlgmr.msra.gmra.mxu0 %v52_v17 }
  0xfd   :  { %v251_v19 = vpop.f32.mrf.mxu0 }
  0xfe   :  { %v161_v20 = vadd.f32 %v251_v19, %v196_v18 }
  0xff   :  { %v135_v21 = vpop.f32.mrf.mxu0 }
 0x100   :  { %v163_v22 = vmin.f32 %v161_v20, 0.0  ;;  %v160_v23 = vadd.f32 %v196_v18, %v135_v21  ;;  %vm171_vm0 = vcmp.gt.f32.partialorder %v161_v20, 0.0 }
 0x102   :  { %v166_v24 = vmul.f32 1.442695, %v163_v22  ;;  %v162_v25 = vmin.f32 %v160_v23, 0.0  ;;  %vm170_vm1 = vcmp.gt.f32.partialorder %v160_v23, 0.0 }
 0x104   :  { %257 = vpow2.f32 %v166_v24  ;;  %v164_v26 = vmul.f32 1.442695, %v162_v25 }
 0x106   :  { %259 = vpow2.f32 %v164_v26 }
 0x111   :  { %v258_v27 = vpop.eup %257 }
 0x112   :  { %v198_v28 = vadd.f32 -1.0, %v258_v27 }
 0x113   :  { %v260_v29 = vpop.eup %259 }
 0x114   :  { %v173_v30 = vsel %vm171_vm0, %v161_v20, %v198_v28  ;;  %v197_v31 = vadd.f32 -1.0, %v260_v29 }
 0x115   :  { %v175_v32 = vadd.f32 2.0, %v173_v30 }
 0x116   :  { %v172_v33 = vsel %vm170_vm1, %v160_v23, %v197_v31 }
 0x117   :  { %177 = vst [vmem:[#allocation8 + $0x8] sm:$0xff] %v175_v32  ;;  %v174_v34 = vadd.f32 2.0, %v172_v33 }
 0x119   :  { %176 = vst [vmem:[#allocation8] sm:$0xff] %v174_v34 }
 0x11a   :  { %312 = shalt.err (!%p309_p0)
}
 0x11b   :  { %189 = dma.vmem_to_hbm [thread:$0]  %s184_s25, 256, %s376_s3, [#allocation5], %s328_s15, %s328_s15, %s329_s16  }
 0x11c   :  { %325 = dma.done.wait [#allocation5], 256  }
 0x11d   :  { %326 = vsyncadd [#allocation5], 4294967040 }
 0x11e   :  { %193 = vsyncpa [#allocation4], 1 }
 0x11f   :  { %194 = vsyncpa [#allocation7], 1 }
 0x120   :  { %195 = vsyncpa [#allocation5], 1 }

</bundles_post_ra>
